<compile_context>
chip_gen: v7x
topology: tpu7x:2x2x1
jax: 0.10.0
libtpu: 0.0.40
codegen_flags: <defaults>
</compile_context>

<pallas_src>
import math

import numpy as np
import jax
import jax.numpy as jnp
from jax import lax
from jax.experimental import pallas as pl
from jax.experimental.pallas import tpu as pltpu


# ----------------------------- config (small) --------------------------------
B = 2                 # batch
S = 8                 # seq len (q_len == kv_seq_len, no cache)
HIDDEN = 32           # hidden_size
NUM_HEADS = 4         # num_attention_heads
NUM_KV_HEADS = 2      # num_key_value_heads
HEAD_DIM = HIDDEN // NUM_HEADS          # 8
N_REP = NUM_HEADS // NUM_KV_HEADS       # 2
PARTIAL_ROTARY_FACTOR = 0.5
ROT_DIM = int(PARTIAL_ROTARY_FACTOR * HEAD_DIM)   # 4
ROPE_THETA = 10000.0

Q_DIM = NUM_HEADS * HEAD_DIM            # 32
KV_DIM = NUM_KV_HEADS * HEAD_DIM        # 16
QKV_DIM = Q_DIM + 2 * KV_DIM            # 64
K_OFF = Q_DIM                           # start of k columns inside fused qkv
V_OFF = Q_DIM + KV_DIM                  # start of v columns inside fused qkv

NEG_BIG = -1e30                         # finite mask fill (avoids -inf edge case)
NEG_INF = jnp.finfo(jnp.float32).min    # only for the pure-JAX reference

# MXU operand dtype.  Keep f32 here to match the PyTorch f32 reference bit-for
# tolerance; on v6e/v7x set to jnp.bfloat16 for ~3x effective MXU throughput
# (all softmax math and accumulation stay f32 via preferred_element_type).
MATMUL_DTYPE = jnp.float32


# ------------------------------- Pallas kernel -------------------------------
def phi_sdpa_kernel(x_ref, wbig_ref, bbig_ref, cossin_ref, wd_ref, bd_ref,
                    out_ref):
    """One grid step = one batch element, fully in VMEM/vregs.

    x_ref      : (S, HIDDEN)        input slab for this batch element
    wbig_ref   : (HIDDEN, 2*QKV_DIM) fused [Wqkv | Wqkv@R]  (128 lanes, dense)
    bbig_ref   : (1, 2*QKV_DIM)      fused [bqkv | bqkv@R]
    cossin_ref : (S, 2*QKV_DIM)      [cos | sin] head-tiled tables
    wd_ref     : (HIDDEN, HIDDEN)    dense (output) weight
    bd_ref     : (1, HIDDEN)         dense bias
    out_ref    : (S, HIDDEN)
    """
    s, hid = x_ref.shape
    x = x_ref[...].astype(MATMUL_DTYPE)

    # --- fused QKV + rotated-QKV projection: single lane-dense N=128 matmul ---
    z = jnp.dot(x, wbig_ref[...].astype(MATMUL_DTYPE),
                preferred_element_type=jnp.float32) + bbig_ref[...]   # (S, 128)

    # --- RoPE: one VPU multiply by [cos|sin], then fold the two 64-lane halves.
    #     V columns pass through (cos=1, sin=0, zero rotate block).
    z = z * cossin_ref[...]
    qkv = z[:, :QKV_DIM] + z[:, QKV_DIM:]                             # (S, 64)

    # causal mask for one batch element, tiled over the N_REP grouped q heads
    row = lax.broadcasted_iota(jnp.int32, (s, s), 0)
    col = lax.broadcasted_iota(jnp.int32, (s, s), 1)
    causal = col <= row
    causal_g = jnp.concatenate([causal] * N_REP, axis=0)              # (N_REP*S, S)

    # dense-projection accumulator, seeded with the dense bias
    acc = jnp.broadcast_to(bd_ref[...], (s, hid)).astype(jnp.float32)

    # --- GQA-grouped attention (static loop: NUM_KV_HEADS iterations) ---
    for kv in range(NUM_KV_HEADS):
        k_kv = qkv[:, K_OFF + kv * HEAD_DIM:K_OFF + (kv + 1) * HEAD_DIM]
        v_kv = qkv[:, V_OFF + kv * HEAD_DIM:V_OFF + (kv + 1) * HEAD_DIM]
        # stack the N_REP query heads sharing this KV head -> M = N_REP*S
        q_grp = jnp.concatenate(
            [qkv[:, (kv * N_REP + r) * HEAD_DIM:(kv * N_REP + r + 1) * HEAD_DIM]
             for r in range(N_REP)],
            axis=0)                                                   # (N_REP*S, HEAD_DIM)

        # scores = q_grp @ k_kv^T, with the transpose folded into the MXU feed
        # (contract last dim of both operands).  1/sqrt(HEAD_DIM) is already
        # folded into the Q columns of wbig/bbig.
        scores = lax.dot_general(
            q_grp.astype(MATMUL_DTYPE), k_kv.astype(MATMUL_DTYPE),
            (((1,), (1,)), ((), ())),
            preferred_element_type=jnp.float32)                       # (N_REP*S, S)
        scores = jnp.where(causal_g, scores, NEG_BIG)
        m = jnp.max(scores, axis=-1, keepdims=True)
        p = jnp.exp(scores - m)
        denom = jnp.sum(p, axis=-1, keepdims=True)
        probs = p * pl.reciprocal(denom, approx=True)

        o_grp = jnp.dot(probs.astype(MATMUL_DTYPE), v_kv.astype(MATMUL_DTYPE),
                        preferred_element_type=jnp.float32)           # (N_REP*S, HEAD_DIM)

        # fold the output projection per head: sublane slices only, no lane
        # concatenation of 8-lane head blocks.
        for r in range(N_REP):
            h = kv * N_REP + r
            acc = acc + jnp.dot(
                o_grp[r * s:(r + 1) * s, :].astype(MATMUL_DTYPE),
                wd_ref[h * HEAD_DIM:(h + 1) * HEAD_DIM, :].astype(MATMUL_DTYPE),
                preferred_element_type=jnp.float32)                   # (S, HIDDEN)

    out_ref[...] = acc.astype(out_ref.dtype)


def phi_sdpa_attention(x, wbig, bbig, cossin, wd, bd):
    """x: (B, S, HIDDEN) float32 -> (B, S, HIDDEN) float32."""
    bsz, slen, hid = x.shape
    x2 = x.reshape(bsz * slen, hid)      # lane-dense 2-D slab; no in-kernel reshape

    def full(arr):
        return pl.BlockSpec(arr.shape, lambda b: (0,) * arr.ndim)

    out2 = pl.pallas_call(
        phi_sdpa_kernel,
        out_shape=jax.ShapeDtypeStruct((bsz * slen, hid), jnp.float32),
        grid_spec=pltpu.PrefetchScalarGridSpec(
            num_scalar_prefetch=0,
            grid=(bsz,),                                   # batch shards across TCs
            in_specs=[
                pl.BlockSpec((slen, hid), lambda b: (b, 0)),   # x slab, per batch
                full(wbig),              # fused [Wqkv | Wqkv@R]   (HIDDEN, 128)
                full(bbig),              # fused [bqkv | bqkv@R]   (1, 128)
                full(cossin),            # [cos | sin] tables      (S, 128)
                full(wd),                # dense weight            (HIDDEN, HIDDEN)
                full(bd),                # dense bias              (1, HIDDEN)
            ],
            out_specs=pl.BlockSpec((slen, hid), lambda b: (b, 0)),
        ),
        compiler_params=pltpu.CompilerParams(dimension_semantics=("parallel",)),
    )(x2, wbig, bbig, cossin, wd, bd)
    return out2.reshape(bsz, slen, hid)


# ------------------------------- glue / setup --------------------------------
def make_rope_tables(seq_len):
    """PhiRotaryEmbedding cos/sin caches + head-tiled tables for the fused slab."""
    inv_freq = 1.0 / (ROPE_THETA ** (jnp.arange(0, ROT_DIM, 2, dtype=jnp.float32) / ROT_DIM))
    t = jnp.arange(seq_len, dtype=jnp.float32)
    freqs = jnp.outer(t, inv_freq)                    # (S, ROT_DIM//2)
    emb = jnp.concatenate([freqs, freqs], axis=-1)    # (S, ROT_DIM)
    cos = jnp.cos(emb)
    sin = jnp.sin(emb)

    # per-head tables padded to HEAD_DIM (tail dims: cos=1, sin=0 -> pass-through)
    cos_head = jnp.concatenate(
        [cos, jnp.ones((seq_len, HEAD_DIM - ROT_DIM), jnp.float32)], -1)
    sin_head = jnp.concatenate(
        [sin, jnp.zeros((seq_len, HEAD_DIM - ROT_DIM), jnp.float32)], -1)

    n_rope_heads = NUM_HEADS + NUM_KV_HEADS           # q heads + k heads
    cos_qkv = jnp.concatenate(
        [jnp.tile(cos_head, (1, n_rope_heads)),
         jnp.ones((seq_len, KV_DIM), jnp.float32)], axis=-1)   # (S, QKV_DIM)
    sin_qkv = jnp.concatenate(
        [jnp.tile(sin_head, (1, n_rope_heads)),
         jnp.zeros((seq_len, KV_DIM), jnp.float32)], axis=-1)  # (S, QKV_DIM)
    return cos, sin, cos_qkv, sin_qkv


def make_rotate_matrix():
    """Block-diagonal R (QKV_DIM x QKV_DIM): rotate_half on q/k heads, 0 on v."""
    r_head = np.zeros((HEAD_DIM, HEAD_DIM), np.float32)
    half = ROT_DIM // 2
    for i in range(half):
        r_head[half + i, i] = -1.0    # out[i]        = -q[i + half]
        r_head[i, half + i] = 1.0     # out[i + half] =  q[i]
    r = np.zeros((QKV_DIM, QKV_DIM), np.float32)
    for h in range(NUM_HEADS + NUM_KV_HEADS):         # q heads then k heads
        r[h * HEAD_DIM:(h + 1) * HEAD_DIM, h * HEAD_DIM:(h + 1) * HEAD_DIM] = r_head
    return jnp.asarray(r)                             # v block stays zero


def reference_forward(x, wq, bq, wk, bk, wv, bv, cos, sin, wd, bd):
    """Pure-JAX mirror of the PyTorch PhiSdpaAttention forward (no cache)."""
    q = x @ wq + bq
    k = x @ wk + bk
    v = x @ wv + bv
    q = q.reshape(B, S, NUM_HEADS, HEAD_DIM).transpose(0, 2, 1, 3)
    k = k.reshape(B, S, NUM_KV_HEADS, HEAD_DIM).transpose(0, 2, 1, 3)
    v = v.reshape(B, S, NUM_KV_HEADS, HEAD_DIM).transpose(0, 2, 1, 3)

    cos_b = cos[None, None]   # (1,1,S,ROT_DIM)
    sin_b = sin[None, None]

    def rot_half(t):
        t1, t2 = t[..., :ROT_DIM // 2], t[..., ROT_DIM // 2:]
        return jnp.concatenate([-t2, t1], axis=-1)

    q_rot, q_pass = q[..., :ROT_DIM], q[..., ROT_DIM:]
    k_rot, k_pass = k[..., :ROT_DIM], k[..., ROT_DIM:]
    q_rot = q_rot * cos_b + rot_half(q_rot) * sin_b
    k_rot = k_rot * cos_b + rot_half(k_rot) * sin_b
    q = jnp.concatenate([q_rot, q_pass], -1)
    k = jnp.concatenate([k_rot, k_pass], -1)

    k = jnp.repeat(k, N_REP, axis=1)
    v = jnp.repeat(v, N_REP, axis=1)

    scores = jnp.einsum("bhqd,bhkd->bhqk", q, k) / math.sqrt(HEAD_DIM)
    mask = jnp.tril(jnp.ones((S, S), bool))
    scores = jnp.where(mask, scores, NEG_INF)
    probs = jax.nn.softmax(scores, axis=-1)
    out = jnp.einsum("bhqk,bhkd->bhqd", probs, v)
    out = out.transpose(0, 2, 1, 3).reshape(B, S, HIDDEN)
    return out @ wd + bd


if __name__ == "__main__":
    key = jax.random.PRNGKey(0)
    keys = jax.random.split(key, 10)

    x = jax.random.normal(keys[0], (B, S, HIDDEN), jnp.float32)

    # deterministic "Linear" parameters (stored as (in, out) so kernel does x @ W + b)
    wq = jax.random.normal(keys[1], (HIDDEN, Q_DIM), jnp.float32) * 0.05
    bq = jax.random.normal(keys[2], (1, Q_DIM), jnp.float32) * 0.05
    wk = jax.random.normal(keys[3], (HIDDEN, KV_DIM), jnp.float32) * 0.05
    bk = jax.random.normal(keys[4], (1, KV_DIM), jnp.float32) * 0.05
    wv = jax.random.normal(keys[5], (HIDDEN, KV_DIM), jnp.float32) * 0.05
    bv = jax.random.normal(keys[6], (1, KV_DIM), jnp.float32) * 0.05
    wd = jax.random.normal(keys[7], (Q_DIM, HIDDEN), jnp.float32) * 0.05
    bd = jax.random.normal(keys[8], (1, HIDDEN), jnp.float32) * 0.05

    # ---- host-side weight folding for the kernel ----
    # fold 1/sqrt(HEAD_DIM) into the Q columns (RoPE is linear, so it commutes)
    scale = 1.0 / math.sqrt(HEAD_DIM)
    wqkv = jnp.concatenate([wq * scale, wk, wv], axis=1)      # (HIDDEN, QKV_DIM)
    bqkv = jnp.concatenate([bq * scale, bk, bv], axis=1)      # (1, QKV_DIM)

    rot_qkv = make_rotate_matrix()                            # (QKV_DIM, QKV_DIM)
    wbig = jnp.concatenate([wqkv, wqkv @ rot_qkv], axis=1)    # (HIDDEN, 2*QKV_DIM)=... x128
    bbig = jnp.concatenate([bqkv, bqkv @ rot_qkv], axis=1)    # (1, 128)

    cos, sin, cos_qkv, sin_qkv = make_rope_tables(S)
    cossin = jnp.concatenate([cos_qkv, sin_qkv], axis=1)      # (S, 128) lane-dense

    out = phi_sdpa_attention(x, wbig, bbig, cossin, wd, bd)
    out = jax.block_until_ready(out)

    ref = reference_forward(x, wq, bq, wk, bk, wv, bv, cos, sin, wd, bd)
    assert out.shape == (B, S, HIDDEN)
    assert jnp.max(jnp.abs(out - ref)) < 1e-3, "mismatch vs pure-JAX reference"

    print("KERNEL_OK")
</pallas_src>

<mosaic_0001>
module attributes {stable_mosaic.version = 11 : i64} {
  func.func @phi_sdpa_kernel(%arg0: i32, %arg1: memref<8x32xf32, #tpu.memory_space<vmem>>, %arg2: memref<32x128xf32, #tpu.memory_space<vmem>>, %arg3: memref<1x128xf32, #tpu.memory_space<vmem>>, %arg4: memref<8x128xf32, #tpu.memory_space<vmem>>, %arg5: memref<32x32xf32, #tpu.memory_space<vmem>>, %arg6: memref<1x32xf32, #tpu.memory_space<vmem>>, %arg7: memref<8x32xf32, #tpu.memory_space<vmem>>) attributes {dimension_semantics = [#tpu.dimension_semantics<parallel>], iteration_bounds = array<i64: 2>, scalar_prefetch = 0 : i64, scratch_operands = 0 : i64, tpu.core_type = #tpu.core_type<tc>, window_params = [{transform_indices = @transform_0, window_bounds = array<i64: 8, 32>}, {pipeline_mode = #tpu.pipeline_mode<synchronous>, transform_indices = @transform_1, window_bounds = array<i64: 32, 128>}, {pipeline_mode = #tpu.pipeline_mode<synchronous>, transform_indices = @transform_2, window_bounds = array<i64: 1, 128>}, {pipeline_mode = #tpu.pipeline_mode<synchronous>, transform_indices = @transform_3, window_bounds = array<i64: 8, 128>}, {pipeline_mode = #tpu.pipeline_mode<synchronous>, transform_indices = @transform_4, window_bounds = array<i64: 32, 32>}, {pipeline_mode = #tpu.pipeline_mode<synchronous>, transform_indices = @transform_5, window_bounds = array<i64: 1, 32>}, {transform_indices = @transform_6, window_bounds = array<i64: 8, 32>}]} {
    %c0 = arith.constant 0 : index
    %c0_0 = arith.constant 0 : index
    %0 = vector.load %arg1[%c0, %c0_0] : memref<8x32xf32, #tpu.memory_space<vmem>>, vector<8x32xf32>
    %c0_1 = arith.constant 0 : index
    %c0_2 = arith.constant 0 : index
    %1 = vector.load %arg2[%c0_1, %c0_2] : memref<32x128xf32, #tpu.memory_space<vmem>>, vector<32x128xf32>
    %cst = arith.constant dense<0.000000e+00> : vector<8x128xf32>
    %2 = tpu.matmul %0, %1, %cst {dimension_numbers = #tpu.dot_dimension_numbers<[1], [0], [0], [1], [0, 0, 1, 1], [], []>} : vector<8x32xf32>, vector<32x128xf32>, vector<8x128xf32> -> vector<8x128xf32>
    %c0_3 = arith.constant 0 : index
    %c0_4 = arith.constant 0 : index
    %3 = vector.load %arg3[%c0_3, %c0_4] : memref<1x128xf32, #tpu.memory_space<vmem>>, vector<1x128xf32>
    %4 = vector.broadcast %3 : vector<1x128xf32> to vector<8x128xf32>
    %5 = arith.addf %2, %4 : vector<8x128xf32>
    %c0_5 = arith.constant 0 : index
    %c0_6 = arith.constant 0 : index
    %6 = vector.load %arg4[%c0_5, %c0_6] : memref<8x128xf32, #tpu.memory_space<vmem>>, vector<8x128xf32>
    %7 = arith.mulf %5, %6 : vector<8x128xf32>
    %8 = vector.extract_strided_slice %7 {offsets = [0, 0], sizes = [8, 64], strides = [1, 1]} : vector<8x128xf32> to vector<8x64xf32>
    %9 = vector.extract_strided_slice %7 {offsets = [0, 64], sizes = [8, 64], strides = [1, 1]} : vector<8x128xf32> to vector<8x64xf32>
    %10 = arith.addf %8, %9 : vector<8x64xf32>
    %11 = tpu.iota {dimensions = array<i32: 0>} : vector<8x8xi32>
    %12 = tpu.iota {dimensions = array<i32: 1>} : vector<8x8xi32>
    %13 = arith.cmpi sle, %12, %11 : vector<8x8xi32>
    %14 = tpu.concatenate %13, %13 in 0 : vector<8x8xi1>, vector<8x8xi1> -> vector<16x8xi1>
    %c0_7 = arith.constant 0 : index
    %c0_8 = arith.constant 0 : index
    %15 = vector.load %arg6[%c0_7, %c0_8] : memref<1x32xf32, #tpu.memory_space<vmem>>, vector<1x32xf32>
    %16 = vector.shape_cast %15 : vector<1x32xf32> to vector<1x32xf32>
    %17 = vector.broadcast %16 : vector<1x32xf32> to vector<8x32xf32>
    %18 = vector.extract_strided_slice %10 {offsets = [0, 32], sizes = [8, 8], strides = [1, 1]} : vector<8x64xf32> to vector<8x8xf32>
    %19 = vector.extract_strided_slice %10 {offsets = [0, 48], sizes = [8, 8], strides = [1, 1]} : vector<8x64xf32> to vector<8x8xf32>
    %20 = vector.extract_strided_slice %10 {offsets = [0, 0], sizes = [8, 8], strides = [1, 1]} : vector<8x64xf32> to vector<8x8xf32>
    %21 = vector.extract_strided_slice %10 {offsets = [0, 8], sizes = [8, 8], strides = [1, 1]} : vector<8x64xf32> to vector<8x8xf32>
    %22 = tpu.concatenate %20, %21 in 0 : vector<8x8xf32>, vector<8x8xf32> -> vector<16x8xf32>
    %cst_9 = arith.constant dense<0.000000e+00> : vector<16x8xf32>
    %23 = tpu.matmul %22, %18, %cst_9 {dimension_numbers = #tpu.dot_dimension_numbers<[1], [1], [0], [0], [0, 0, 1, 0], [], []>} : vector<16x8xf32>, vector<8x8xf32>, vector<16x8xf32> -> vector<16x8xf32>
    %cst_10 = arith.constant -1.000000e+30 : f32
    %24 = vector.broadcast %cst_10 : f32 to vector<16x8xf32>
    %25 = arith.select %14, %23, %24 : vector<16x8xi1>, vector<16x8xf32>
    %cst_11 = arith.constant dense<0xFF800000> : vector<16xf32>
    %26 = vector.multi_reduction <maximumf>, %25, %cst_11 [1] : vector<16x8xf32> to vector<16xf32>
    %27 = vector.shape_cast %26 : vector<16xf32> to vector<16x1xf32>
    %28 = vector.broadcast %27 : vector<16x1xf32> to vector<16x8xf32>
    %29 = arith.subf %25, %28 : vector<16x8xf32>
    %30 = math.exp %29 : vector<16x8xf32>
    %cst_12 = arith.constant dense<0.000000e+00> : vector<16xf32>
    %31 = vector.multi_reduction <add>, %30, %cst_12 [1] : vector<16x8xf32> to vector<16xf32>
    %32 = vector.shape_cast %31 : vector<16xf32> to vector<16x1xf32>
    %33 = tpu.reciprocal %32 {approx = true} : vector<16x1xf32> -> vector<16x1xf32>
    %34 = vector.broadcast %33 : vector<16x1xf32> to vector<16x8xf32>
    %35 = arith.mulf %30, %34 : vector<16x8xf32>
    %cst_13 = arith.constant dense<0.000000e+00> : vector<16x8xf32>
    %36 = tpu.matmul %35, %19, %cst_13 {dimension_numbers = #tpu.dot_dimension_numbers<[1], [0], [0], [1], [0, 0, 1, 1], [], []>} : vector<16x8xf32>, vector<8x8xf32>, vector<16x8xf32> -> vector<16x8xf32>
    %37 = vector.extract_strided_slice %36 {offsets = [0, 0], sizes = [8, 8], strides = [1, 1]} : vector<16x8xf32> to vector<8x8xf32>
    %c0_14 = arith.constant 0 : index
    %c0_15 = arith.constant 0 : index
    %38 = vector.load %arg5[%c0_14, %c0_15] : memref<32x32xf32, #tpu.memory_space<vmem>>, vector<8x32xf32>
    %cst_16 = arith.constant dense<0.000000e+00> : vector<8x32xf32>
    %39 = tpu.matmul %37, %38, %cst_16 {dimension_numbers = #tpu.dot_dimension_numbers<[1], [0], [0], [1], [0, 0, 1, 1], [], []>} : vector<8x8xf32>, vector<8x32xf32>, vector<8x32xf32> -> vector<8x32xf32>
    %40 = arith.addf %17, %39 : vector<8x32xf32>
    %41 = vector.extract_strided_slice %36 {offsets = [8, 0], sizes = [8, 8], strides = [1, 1]} : vector<16x8xf32> to vector<8x8xf32>
    %c8 = arith.constant 8 : index
    %c0_17 = arith.constant 0 : index
    %42 = vector.load %arg5[%c8, %c0_17] : memref<32x32xf32, #tpu.memory_space<vmem>>, vector<8x32xf32>
    %cst_18 = arith.constant dense<0.000000e+00> : vector<8x32xf32>
    %43 = tpu.matmul %41, %42, %cst_18 {dimension_numbers = #tpu.dot_dimension_numbers<[1], [0], [0], [1], [0, 0, 1, 1], [], []>} : vector<8x8xf32>, vector<8x32xf32>, vector<8x32xf32> -> vector<8x32xf32>
    %44 = arith.addf %40, %43 : vector<8x32xf32>
    %45 = vector.extract_strided_slice %10 {offsets = [0, 40], sizes = [8, 8], strides = [1, 1]} : vector<8x64xf32> to vector<8x8xf32>
    %46 = vector.extract_strided_slice %10 {offsets = [0, 56], sizes = [8, 8], strides = [1, 1]} : vector<8x64xf32> to vector<8x8xf32>
    %47 = vector.extract_strided_slice %10 {offsets = [0, 16], sizes = [8, 8], strides = [1, 1]} : vector<8x64xf32> to vector<8x8xf32>
    %48 = vector.extract_strided_slice %10 {offsets = [0, 24], sizes = [8, 8], strides = [1, 1]} : vector<8x64xf32> to vector<8x8xf32>
    %49 = tpu.concatenate %47, %48 in 0 : vector<8x8xf32>, vector<8x8xf32> -> vector<16x8xf32>
    %cst_19 = arith.constant dense<0.000000e+00> : vector<16x8xf32>
    %50 = tpu.matmul %49, %45, %cst_19 {dimension_numbers = #tpu.dot_dimension_numbers<[1], [1], [0], [0], [0, 0, 1, 0], [], []>} : vector<16x8xf32>, vector<8x8xf32>, vector<16x8xf32> -> vector<16x8xf32>
    %cst_20 = arith.constant -1.000000e+30 : f32
    %51 = vector.broadcast %cst_20 : f32 to vector<16x8xf32>
    %52 = arith.select %14, %50, %51 : vector<16x8xi1>, vector<16x8xf32>
    %cst_21 = arith.constant dense<0xFF800000> : vector<16xf32>
    %53 = vector.multi_reduction <maximumf>, %52, %cst_21 [1] : vector<16x8xf32> to vector<16xf32>
    %54 = vector.shape_cast %53 : vector<16xf32> to vector<16x1xf32>
    %55 = vector.broadcast %54 : vector<16x1xf32> to vector<16x8xf32>
    %56 = arith.subf %52, %55 : vector<16x8xf32>
    %57 = math.exp %56 : vector<16x8xf32>
    %cst_22 = arith.constant dense<0.000000e+00> : vector<16xf32>
    %58 = vector.multi_reduction <add>, %57, %cst_22 [1] : vector<16x8xf32> to vector<16xf32>
    %59 = vector.shape_cast %58 : vector<16xf32> to vector<16x1xf32>
    %60 = tpu.reciprocal %59 {approx = true} : vector<16x1xf32> -> vector<16x1xf32>
    %61 = vector.broadcast %60 : vector<16x1xf32> to vector<16x8xf32>
    %62 = arith.mulf %57, %61 : vector<16x8xf32>
    %cst_23 = arith.constant dense<0.000000e+00> : vector<16x8xf32>
    %63 = tpu.matmul %62, %46, %cst_23 {dimension_numbers = #tpu.dot_dimension_numbers<[1], [0], [0], [1], [0, 0, 1, 1], [], []>} : vector<16x8xf32>, vector<8x8xf32>, vector<16x8xf32> -> vector<16x8xf32>
    %64 = vector.extract_strided_slice %63 {offsets = [0, 0], sizes = [8, 8], strides = [1, 1]} : vector<16x8xf32> to vector<8x8xf32>
    %c16 = arith.constant 16 : index
    %c0_24 = arith.constant 0 : index
    %65 = vector.load %arg5[%c16, %c0_24] : memref<32x32xf32, #tpu.memory_space<vmem>>, vector<8x32xf32>
    %cst_25 = arith.constant dense<0.000000e+00> : vector<8x32xf32>
    %66 = tpu.matmul %64, %65, %cst_25 {dimension_numbers = #tpu.dot_dimension_numbers<[1], [0], [0], [1], [0, 0, 1, 1], [], []>} : vector<8x8xf32>, vector<8x32xf32>, vector<8x32xf32> -> vector<8x32xf32>
    %67 = arith.addf %44, %66 : vector<8x32xf32>
    %68 = vector.extract_strided_slice %63 {offsets = [8, 0], sizes = [8, 8], strides = [1, 1]} : vector<16x8xf32> to vector<8x8xf32>
    %c24 = arith.constant 24 : index
    %c0_26 = arith.constant 0 : index
    %69 = vector.load %arg5[%c24, %c0_26] : memref<32x32xf32, #tpu.memory_space<vmem>>, vector<8x32xf32>
    %cst_27 = arith.constant dense<0.000000e+00> : vector<8x32xf32>
    %70 = tpu.matmul %68, %69, %cst_27 {dimension_numbers = #tpu.dot_dimension_numbers<[1], [0], [0], [1], [0, 0, 1, 1], [], []>} : vector<8x8xf32>, vector<8x32xf32>, vector<8x32xf32> -> vector<8x32xf32>
    %71 = arith.addf %67, %70 : vector<8x32xf32>
    %c0_28 = arith.constant 0 : index
    %c0_29 = arith.constant 0 : index
    %72 = vector.load %arg7[%c0_28, %c0_29] : memref<8x32xf32, #tpu.memory_space<vmem>>, vector<8x32xf32>
    tpu.vector_store %arg7[%c0_28, %c0_29], %71 {strides = array<i32>} : memref<8x32xf32, #tpu.memory_space<vmem>>, vector<8x32xf32>,
    return
  }
  func.func @transform_0(%arg0: i32) -> (i32, i32) {
    %c0_i32 = arith.constant 0 : i32
    %c0_i32_0 = arith.constant 0 : i32
    return %arg0, %c0_i32 : i32, i32
  }
  func.func @transform_1(%arg0: i32) -> (i32, i32) {
    %c0_i32 = arith.constant 0 : i32
    %c0_i32_0 = arith.constant 0 : i32
    %c0_i32_1 = arith.constant 0 : i32
    return %c0_i32, %c0_i32_0 : i32, i32
  }
  func.func @transform_2(%arg0: i32) -> (i32, i32) {
    %c0_i32 = arith.constant 0 : i32
    %c0_i32_0 = arith.constant 0 : i32
    %c0_i32_1 = arith.constant 0 : i32
    return %c0_i32, %c0_i32_0 : i32, i32
  }
  func.func @transform_3(%arg0: i32) -> (i32, i32) {
    %c0_i32 = arith.constant 0 : i32
    %c0_i32_0 = arith.constant 0 : i32
    %c0_i32_1 = arith.constant 0 : i32
    return %c0_i32, %c0_i32_0 : i32, i32
  }
  func.func @transform_4(%arg0: i32) -> (i32, i32) {
    %c0_i32 = arith.constant 0 : i32
    %c0_i32_0 = arith.constant 0 : i32
    %c0_i32_1 = arith.constant 0 : i32
    return %c0_i32, %c0_i32_0 : i32, i32
  }
  func.func @transform_5(%arg0: i32) -> (i32, i32) {
    %c0_i32 = arith.constant 0 : i32
    %c0_i32_0 = arith.constant 0 : i32
    %c0_i32_1 = arith.constant 0 : i32
    return %c0_i32, %c0_i32_0 : i32, i32
  }
  func.func @transform_6(%arg0: i32) -> (i32, i32) {
    %c0_i32 = arith.constant 0 : i32
    %c0_i32_0 = arith.constant 0 : i32
    return %arg0, %c0_i32 : i32, i32
  }
}

</mosaic_0001>

<bundles_post_ra>
// kernel: tpu_custom_call.1
= control target key start
LH: loop header
LB: loop body
LE: loop exit
PB: predicated region body
PF: predicated region fallthrough
CT: control target
= control target key end

     0   :  { %11 = vsyncpa [#allocation3], 0  ;;  %s1929_s0 = inlined_call_operand.hbm [shape: f32[16,32], index: 0, kind: input, shape index: {}]   ;;  %s1930_s1 = inlined_call_operand.hbm [shape: f32[32,128], index: 1, kind: input, shape index: {}]   ;;  %s1931_s2 = inlined_call_operand.vmem [shape: f32[1,128], index: 2, kind: input, shape index: {}]   ;;  %s1932_s3 = inlined_call_operand.vmem [shape: f32[8,128], index: 3, kind: input, shape index: {}]   ;;  %s1933_s4 = inlined_call_operand.hbm [shape: f32[32,32], index: 4, kind: input, shape index: {}]   ;;  %s1934_s5 = inlined_call_operand.vmem [shape: f32[1,32], index: 5, kind: input, shape index: {}]   ;;  %s1935_s6 = inlined_call_operand.hbm [shape: f32[16,32], index: 6, kind: output, shape index: {}]  }
   0x1   :  { %13 = vsyncpa [#allocation3 + $0x1], 0 }
   0x2   :  { %14 = vsyncpa [#allocation6], 0 }
   0x3   :  { %15 = vsyncpa [#allocation4], 0 }
   0x4   :  { %17 = vsyncpa [#allocation4 + $0x1], 0  ;;  %s1620_s21 = smov 0   ;;  %s1622_s22 = smov 0  }
   0x5   :  { %s1624_s23 = smov 0   ;;  %s1626_s24 = smov 0  }
   0x6 LB: > { %s1641_s25 = sadd.s32 4294967295, %s1567_s24   ;;  %s1195_s26 = sadd.s32 4294967294, %s1567_s24   ;;  %s1567_s24 = sphi %s1626_s24, %s1955_s24   ;;  %s1563_s23 = sphi %s1624_s23, %s1954_s23   ;;  %s1559_s22 = sphi %s1622_s22, %s1953_s22   ;;  %s1555_s21 = sphi %s1620_s21, %s1952_s21  }
   0x7   : > { %p43_p0 = scmp.ne.s32.totalorder %s1559_s22, %s1555_s21  ;;  %p1936_p1 = scmp.eq.s32.totalorder %s1641_s25, 0 }
   0x8   : > { %p178_p3 = scmp.eq.s32.totalorder %s1195_s26, 1  ;;  %p1196_p5 = scmp.ge.s32.totalorder %s1567_s24, 1 }
   0x9   : > { %p1650_p4 = por %p1936_p1, %p43_p0  ;;  %p185_p7 = scmp.lt.s32.totalorder %s1567_s24, 3 }
   0xa   : > { %p1655_p6 = por %p178_p3, %p43_p0  ;;  %s1569_s30 = smov [#allocation5]  }
   0xb   : > { %s1939_s27 = scalar_select %p1650_p4, 1, 0 }
   0xc   : > { %s1940_s28 = scalar_select %p1655_p6, 1, 0 }
   0xd   : > { %p1660_p8 = pnand %p1196_p5, %p185_p7  ;;  %s197_s7 = sshll.u32 %s1569_s30, 4  ;;  %s1664_s7 = int_to_ptr.vmem [resolvable:$true] %s197_s7 }
   0xe   : > { %s1570_s9 = smov [#allocation7]   ;;  %s1411_s13 = scalar_lea.hbm %s1930_s1, 512 }
   0xf   : > { %p1328_p9 = pneg %p1660_p8  ;;  %s216_s10 = sshll.u32 %s1570_s9, 4  ;;  %s1675_s10 = int_to_ptr.vmem [resolvable:$true] %s216_s10 }
  0x10   : > { %p1412_p12 = scmp.ne.s32.totalorder %s1930_s1, %s1411_s13  ;;  %p1418_p5 = scmp.lt.u32.totalorder %s1411_s13, %s1930_s1 }
  0x11   : > { %p1671_p11 = pnand %p1328_p9, %p1936_p1 }
  0x13   : > { %p1413_p13 = pneg %p1671_p11 }
  0x15   : > { %p1414_p0 = pnand %p1413_p13, %p1412_p12 }
  0x17   : > { %p1415_p3 = pneg %p1414_p0 }
  0x19   : > { %p1420_p7 = pnand %p1418_p5, %p1415_p3 }
  0x1b   : > { %1423 = shalt.err (!%p1420_p7)
}
  0x1c   : > { %s1424_s18 = scalar_lea.vmem %s1664_s7, 512  ;;  %p1432_p2 = scmp.lt.s32.totalorder %s1664_s7, %s1664_s7 }
  0x1d   : > { %p1425_p9 = scmp.ne.s32.totalorder %s1664_s7, %s1424_s18  ;;  %p1433_p12 = scmp.lt.s32.totalorder %s1424_s18, %s1424_s18 }
  0x1f   : > { %p1427_p10 = pnand %p1425_p9, %p1413_p13  ;;  %p1434_p0 = por %p1433_p12, %p1432_p2 }
  0x21   : > { %p1428_p1 = pneg %p1427_p10 }
  0x23   : > { %p1435_p6 = pnand %p1434_p0, %p1428_p1 }
  0x25   : > { %1438 = shalt.err (!%p1435_p6)
}
  0x26   : > { %s1571_s19 = smov 128   ;;  %s1572_s20 = smov 8  }
  0x27   : > { %1331 = dma.hbm_to_vmem [thread:$0]  (!%p1671_p11), %s1930_s1, 512, %s1664_s7, [#allocation6], %s1571_s19, %s1571_s19, %s1572_s20  }
  0x28   : > { %s1439_s12 = scalar_lea.hbm %s1933_s4, 512 }
  0x29   : > { %p1440_p2 = scmp.ne.s32.totalorder %s1933_s4, %s1439_s12  ;;  %p1446_p10 = scmp.lt.u32.totalorder %s1439_s12, %s1933_s4 }
  0x2b   : > { %p1442_p1 = pnand %p1440_p2, %p1413_p13 }
  0x2d   : > { %p1443_p6 = pneg %p1442_p1 }
  0x2f   : > { %p1448_p3 = pnand %p1446_p10, %p1443_p6 }
  0x31   : > { %1451 = shalt.err (!%p1448_p3)
}
  0x32   : > { %s1452_s7 = scalar_lea.vmem %s1675_s10, 512  ;;  %p1460_p12 = scmp.lt.s32.totalorder %s1675_s10, %s1675_s10 }
  0x33   : > { %p1453_p5 = scmp.ne.s32.totalorder %s1675_s10, %s1452_s7  ;;  %p1461_p0 = scmp.lt.s32.totalorder %s1452_s7, %s1452_s7 }
  0x35   : > { %p1455_p7 = pnand %p1453_p5, %p1413_p13  ;;  %p1462_p2 = por %p1461_p0, %p1460_p12 }
  0x37   : > { %p1456_p9 = pneg %p1455_p7 }
  0x39   : > { %p1463_p1 = pnand %p1462_p2, %p1456_p9 }
  0x3b   : > { %1466 = shalt.err (!%p1463_p1)
}
  0x3c   : > { %1334 = dma.hbm_to_vmem [thread:$0]  (!%p1671_p11), %s1933_s4, 512, %s1675_s10, [#allocation6], %s1571_s19, %s1571_s19, %s1572_s20  }
  0x3d   : > { %s1730_s26 = sadd.s32 1, %s1567_s24   ;;  %s30_s8 = sadd.s32 1, %s1563_s23 }
  0x3e   : > { %s27_s30 = ssub.s32 %s1567_s24, %s1730_s26  ;;  %p37_p13 = scmp.ne.s32.totalorder %s1563_s23, %s1559_s22 }
  0x3f   : > { %p28_p6 = scmp.eq.s32.totalorder %s27_s30, 0  ;;  %p38_p10 = scmp.eq.s32.totalorder %s1567_s24, 0 }
  0x40   : > { %p1943_p3 = scmp.eq.s32.totalorder %s1641_s25, 1  ;;  %p1345_p7 = scmp.lt.s32.totalorder %s1567_s24, 2 }
  0x41   : > { %s1746_s11 = scalar_select %p28_p6, %s1563_s23, %s30_s8  }
  0x42   : > { %p1740_p5 = por %p1943_p3, %p37_p13  ;;  %p39_p9 = por %p38_p10, %p37_p13 }
  0x43   : > { %s233_s12 = sand.u32 1, %s1563_s23   ;;  %s1201_s10 = sshll.u32 %s1567_s24, 7 }
  0x44   : > { %s1944_s9 = scalar_select %p1740_p5, 1, 0 }
  0x45   : > { %s1200_s13 = sshll.u32 %s233_s12, 3  ;;  %s1753_s14 = scalar_lea.hbm %s1929_s0, %s1201_s10 }
  0x46   : > { %s237_s15 = scalar_lea.vmem [#allocation2], %s1200_s13  ;;  %p1757_p11 = pnand %p1345_p7, %p39_p9 }
  0x47   : > { %s244_s16 = sshll.u32 %s237_s15, 4  ;;  %s234_s17 = scalar_lea.sflag [#allocation3], %s233_s12  ;;  %s1755_s16 = int_to_ptr.vmem [resolvable:$true] %s244_s16 }
  0x48   : > { %s1467_s18 = scalar_lea.hbm %s1753_s14, 128  ;;  %p1469_p0 = pneg %p1757_p11 }
  0x49   : > { %p1468_p12 = scmp.ne.s32.totalorder %s1753_s14, %s1467_s18  ;;  %s1472_s13 = scalar_lea.hbm %s1929_s0, 256 }
  0x4a   : > { %p1473_p13 = scmp.lt.u32.totalorder %s1753_s14, %s1929_s0  ;;  %p1474_p6 = scmp.lt.u32.totalorder %s1472_s13, %s1467_s18 }
  0x4b   : > { %p1470_p2 = pnand %p1469_p0, %p1468_p12  ;;  %p1476_p3 = scmp.lt.u32.totalorder %s1467_s18, %s1753_s14 }
  0x4c   : > { %p1475_p10 = por %p1474_p6, %p1473_p13 }
  0x4d   : > { %p1471_p1 = pneg %p1470_p2 }
  0x4e   : > { %p1477_p7 = por %p1476_p3, %p1475_p10 }
  0x50   : > { %p1478_p9 = pnand %p1477_p7, %p1471_p1 }
  0x52   : > { %1481 = shalt.err (!%p1478_p9)
}
  0x53   : > { %s1482_s12 = scalar_lea.vmem %s1755_s16, 128  ;;  %s1573_s20 = smov [#allocation2]  }
  0x54   : > { %p1483_p12 = scmp.ne.s32.totalorder %s1755_s16, %s1482_s12  ;;  %s1487_s15 = sshll.u32 %s1573_s20, 4  ;;  %s1488_s15 = int_to_ptr.vmem [resolvable:$false] %s1487_s15 }
  0x55   : > { %s1489_s8 = scalar_lea.vmem %s1488_s15, 256  ;;  %p1490_p4 = scmp.lt.s32.totalorder %s1755_s16, %s1488_s15 }
  0x56   : > { %p1485_p2 = pnand %p1483_p12, %p1469_p0  ;;  %p1491_p13 = scmp.lt.s32.totalorder %s1489_s8, %s1482_s12 }
  0x58   : > { %p1486_p5 = pneg %p1485_p2  ;;  %p1492_p6 = por %p1491_p13, %p1490_p4 }
  0x5a   : > { %p1493_p10 = pnand %p1492_p6, %p1486_p5 }
  0x5c   : > { %1496 = shalt.err (!%p1493_p10)
}
  0x5d   : > { %1338 = dma.hbm_to_vmem [thread:$0]  (!%p1757_p11), %s1753_s14, 128, %s1755_s16, %s234_s17  }
  0x5e   : > { %253 = sbr.rel (%p1660_p8) target bundleno = 2291 (0x8f3), region = 44  ;;  %s1789_s18 = sand.u32 (!%p1660_p8), 1, %s1559_s22  }
  0x5f   : > { %s1203_s30 = sshll.u32 (!%p1660_p8), %s1789_s18, 3  ;;  %s256_s13 = scalar_lea.sflag (!%p1660_p8), [#allocation3], %s1789_s18 }
  0x60   : > { %s259_s10 = scalar_lea.vmem (!%p1660_p8), [#allocation2], %s1203_s30  ;;  %p1946_p4 = scmp.ne.s32.totalorder (!%p1660_p8), %s1939_s27, 0 }
  0x65   : > { %1542 = dma.done.wait (%p1946_p4), %s256_s13, 128  }
  0x66   : > { %1544 = vsyncadd (%p1946_p4), %s256_s13, 4294967168  ;;  %p1947_p5 = scmp.eq.s32.totalorder %s1641_s25, 0 }
  0x68   : > { %1546 = dma.done.wait (%p1947_p5), [#allocation6], 1024   ;;  %p1948_p8 = pmov %p1947_p5 }
  0x69   : > { %v1574_v0 = vmov 0.0|0.0   ;;  %vm1575_vm0 = vmmov 0   ;;  %v1576_v1 = vmov 0.0   ;;  %v297_v2 = vld [vmem:[#allocation5] sm:$0xff]  ;;  %v298_v3 = vld [vmem:[#allocation5 + $0x8] sm:$0xff]  ;;  %v299_v4 = vld [vmem:[#allocation5 + $0x10] sm:$0xff]  ;;  %v389_v19 = vlaneseq }
  0x6a   : > { %1548 = vsyncadd (%p1948_p8), [#allocation6], 4294966272  ;;  %1304 = vmatprep.subr.bf16.mxu0 %v1574_v0  ;;  %1261 = vmatprep.mubr.msk.f32.mxu0 %vm1575_vm0, %v1576_v1  ;;  %v1305_v5 = vpack.c.bf16 %v298_v3, %v297_v2  ;;  %v300_v6 = vld [vmem:[#allocation5 + $0x18] sm:$0xff]  ;;  %vm308_vm1 = vcmask 261120   ;;  %v1207_v9 = vld [vmem:[%s1931_s2] ss:$0 sm:$0xff] }
  0x6b   : > { %v1308_v7 = vpack.c.bf16 %v300_v6, %v299_v4  ;;  %v296_v8 = vld [vmem:[%s259_s10] sm:$0xff]  ;;  %s1577_s7 = smov 64   ;;  %vm406_vm2 = vcmask 64512   ;;  %s1578_s17 = smov 120   ;;  %v1824_v20 = vshrl.u32 %v389_v19, 7  ;;  %v1826_v21 = vand.u32 127, %v389_v19 }
  0x6c   : > { %1306 = vmatpush3.bf16.msra.mxu0 %v1305_v5  ;;  %v382_v11 = vld [vmem:[%s1932_s3] sm:$0xff]  ;;  %s1579_s19 = smov 96   ;;  %s1580_s12 = smov 88   ;;  %v596_v45 = vld [vmem:[#allocation7] sm:$0xff]  ;;  %v671_v47 = vld [vmem:[#allocation7 + $0x8] sm:$0xff] }
  0x6d   : > { %1307 = vmatprep.subr.bf16.mxu0 %v1574_v0  ;;  %vm393_vm3 = vcmp.le.s32.totalorder %v1826_v21, %v1824_v20  ;;  %s1581_s20 = smov 112   ;;  %s1582_s15 = smov 80  }
  0x6e   : > { %s1583_s8 = smov 72   ;;  %s1225_s27 = sshll.u32 %s1641_s25, 7 }
  0x6f   : > { %s295_s29 = scalar_lea.vmem [#allocation8], %s1203_s30  ;;  %s1093_s25 = scalar_lea.sflag [#allocation4], %s1789_s18 }
  0x70   : > { %1309 = vmatpush3.bf16.msra.mxu0 %v1308_v7  ;;  %v941_v7 = vld [vmem:[#allocation7 + $0x10] sm:$0xff]  ;;  %s1106_s14 = sshll.u32 %s295_s29, 4  ;;  %p1949_p0 = scmp.ne.s32.totalorder %s1944_s9, 0  ;;  %s1886_s14 = int_to_ptr.vmem [resolvable:$true] %s1106_s14 }
  0x71   : > { %1279 = vmatprep.subr.mxu0 %v1576_v1  ;;  %s1584_s30 = smov [#allocation8]  }
  0x73   : > { %1262 = vmatmul.mubr.msk.f32.vlgmr.msra.gmra.mrb[0].mxu0 %vm308_vm1, %v296_v8 }
  0x74   : > { %1281 = vmatprep.mubr.msk.f32.mxu0 %vm1575_vm0, %v1576_v1  ;;  %1280 = vmatpush3.msra.mxu0 %v671_v47 }
  0x75   : > { %1294 = vmatprep.subr.mxu0 %v1576_v1 }
 0x146   : > { %v378_v10 = vpop.f32.mrb[0].mxu0 }
 0x147   : > { %v379_v12 = vadd.f32 %v1207_v9, %v378_v10  ;;  %v1263_v13 = vpop.f32.mrb[1].mxu0 }
 0x149   : > { %v383_v14 = vmul.f32 %v382_v11, %v379_v12 }
 0x14b   : > { %385 = vrot.lane.b32.xlu0 %v383_v14, %s1577_s7 }
 0x1bd   : > { %v386_v15 = vpop.permute.xlu0 %385 }
 0x1be   : > { %v1815_v16 = vadd.f32 %v386_v15, %v383_v14 }
 0x1c0   : > { %402 = vrot.lane.b32.xlu1 %v1815_v16, %s1578_s17  ;;  %404 = vrot.lane.b32.xlu0 %v1815_v16, %s1579_s19  ;;  %s1884_s17 = scalar_lea.hbm %s1935_s6, %s1225_s27  ;;  %s1497_s19 = scalar_lea.vmem %s1886_s14, 128 }
 0x1c1   : > { %1266 = vmatprep.mubr.msk.f32.mxu1 %vm406_vm2, %v1815_v16  ;;  %p1498_p11 = scmp.ne.s32.totalorder %s1886_s14, %s1497_s19 }
 0x1c3   : > { %p1499_p1 = pnand %p1498_p11, %p1949_p0 }
 0x1c5   : > { %p1500_p3 = pneg %p1499_p1 }
 0x232   : > { %v405_v17 = vpop.permute.xlu0 %404  ;;  %v403_v18 = vpop.permute.xlu1 %402 }
 0x233   : > { %1264 = vmatprep.subr.msk.mxu1 %vm406_vm2, %v405_v17 }
 0x234   : > { %1265 = vmatpush3.xpose.msk.msra.mxu1 %vm406_vm2, %v405_v17 }
 0x237   : > { %1267 = vmatmul.mubr.msk.f32.vlgmr.msra.gmra.mrb[0].mxu1 %vm406_vm2, %v403_v18 }
 0x30a   : > { %v1268_v22 = vpop.f32.mrb[0].mxu1 }
 0x30b   : > { %v489_v23 = vsel %vm393_vm3, %v1268_v22, -1e+30  ;;  %v479_v24 = vpop.f32.mrb[1].mxu1 }
 0x30c   : > { %v488_v25 = vsel %vm393_vm3, %v479_v24, -1e+30  ;;  %v493_v26 = vsel %vm406_vm2, %v489_v23, -inf }
 0x30d   : > { %494 = vmax.xlane.f32.xlu0 %v493_v26  ;;  %v490_v27 = vsel %vm406_vm2, %v488_v25, -inf }
 0x30e   : > { %491 = vmax.xlane.f32.xlu1 %v490_v27 }
 0x39a   : > { %v495_v28 = vpop.xlane.xlu0 %494 }
 0x39b   : > { %v497_v29 = vsub.f32 %v489_v23, %v495_v28  ;;  %v492_v30 = vpop.xlane.xlu1 %491 }
 0x39c   : > { %v496_v31 = vsub.f32 %v488_v25, %v492_v30 }
 0x39d   : > { %v500_v32 = vmul.f32 1.442695, %v497_v29 }
 0x39e   : > { %v498_v33 = vmul.f32 1.442695, %v496_v31 }
 0x39f   : > { %1395 = vpow2.f32 %v500_v32 }
 0x3a0   : > { %1397 = vpow2.f32 %v498_v33 }
 0x3a9   : > { %v1396_v34 = vpop.eup %1395 }
 0x3aa   : > { %v1398_v35 = vpop.eup %1397  ;;  %v505_v36 = vsel %vm406_vm2, %v1396_v34, 0.0 }
 0x3ab   : > { %506 = vadd.xlane.f32.xlu1 %v505_v36  ;;  %v502_v37 = vsel %vm406_vm2, %v1398_v35, 0.0 }
 0x3ac   : > { %503 = vadd.xlane.f32.xlu0 %v502_v37 }
 0x3bc   : > { %750 = vrot.lane.b32.xlu1 %v1815_v16, %s1580_s12  ;;  %s1501_s12 = sshll.u32 %s1584_s30, 4  ;;  %s1502_s12 = int_to_ptr.vmem [resolvable:$false] %s1501_s12 }
 0x3bd   : > { %p1504_p7 = scmp.lt.s32.totalorder %s1886_s14, %s1502_s12 }
 0x3c0   : > { %746 = vrot.lane.b32.xlu1 %v1815_v16, %s1581_s20 }
 0x3c2   : > { %512 = vrot.lane.b32.xlu0 %v1815_v16, %s1582_s15 }
 0x3c6   : > { %748 = vrot.lane.b32.xlu0 %v403_v18, %s1581_s20  ;;  %v1209_v18 = vld [vmem:[%s1934_s5] ss:$0 sm:$0xff]  ;;  %s1503_s20 = scalar_lea.vmem %s1502_s12, 256 }
 0x3c7   : > { %p1505_p9 = scmp.lt.s32.totalorder %s1503_s20, %s1497_s19 }
 0x3c9   : > { %p1506_p12 = por %p1505_p9, %p1504_p7 }
 0x3cb   : > { %p1507_p2 = pnand %p1506_p12, %p1500_p3 }
 0x438   : > { %v507_v38 = vpop.xlane.xlu1 %506 }
 0x439   : > { %1399 = vrcp.f32 %v507_v38  ;;  %v504_v39 = vpop.xlane.xlu0 %503 }
 0x43a   : > { %1401 = vrcp.f32 %v504_v39 }
 0x43c   : > { %v751_v46 = vpop.permute.xlu1 %750 }
 0x43d   : > { %v513_v40 = vpop.permute.xlu0 %512 }
 0x43e   : > { %1269 = vmatprep.subr.mxu1 %v513_v40 }
 0x43f   : > { %1270 = vmatpush3.msra.mxu1 %v513_v40 }
 0x440   : > { %1274 = vmatprep.subr.mxu1 %v1576_v1  ;;  %v747_v50 = vpop.permute.xlu1 %746 }
 0x441   : > { %v749_v51 = vpop.permute.xlu0 %748 }
 0x443   : > { %v1400_v41 = vpop.eup %1399 }
 0x444   : > { %v1402_v42 = vpop.eup %1401  ;;  %v511_v44 = vmul.f32 %v1400_v41, %v1396_v34 }
 0x445   : > { %v510_v43 = vmul.f32 %v1402_v42, %v1398_v35 }
 0x447   : > { %1271 = vmatprep.mubr.msk.f32.mxu1 %vm406_vm2, %v510_v43 }
 0x448   : > { %1272 = vmatmul.mubr.msk.f32.vlgmr.msra.gmra.mrb[2].mxu1 %vm406_vm2, %v511_v44 }
 0x449   : > { %1275 = vmatpush3.msra.mxu1 %v596_v45  ;;  %1276 = vmatprep.mubr.msk.f32.mxu1 %vm1575_vm0, %v1576_v1 }
 0x44a   : > { %1284 = vmatprep.subr.msk.mxu1 %vm406_vm2, %v751_v46 }
 0x51b   : > { %v1273_v48 = vpop.f32.mrb[2].mxu1 }
 0x51c   : > { %v587_v49 = vpop.f32.mrb[3].mxu1  ;;  %1282 = vmatmul.mubr.msk.f32.vlgmr.msra.gmra.mrb[2].mxu0 %vm406_vm2, %v1273_v48 }
 0x51d   : > { %1277 = vmatmul.mubr.msk.f32.vlgmr.msra.gmra.mrb[4].mxu1 %vm406_vm2, %v587_v49  ;;  %1296 = vmatprep.mubr.msk.f32.mxu0 %vm1575_vm0, %v1576_v1 }
 0x51e   : > { %1285 = vmatpush3.xpose.msk.msra.mxu1 %vm406_vm2, %v751_v46  ;;  %1286 = vmatprep.mubr.msk.f32.mxu1 %vm406_vm2, %v747_v50 }
 0x51f   : > { %1295 = vmatpush3.msra.mxu0 %v941_v7 }
 0x520   : > { %1299 = vmatprep.subr.mxu0 %v1576_v1 }
 0x521   : > { %1287 = vmatmul.mubr.msk.f32.vlgmr.msra.gmra.mrb[6].mxu1 %vm406_vm2, %v749_v51 }
 0x5f0   : > { %v666_v52 = vpop.f32.mrb[4].mxu1 }
 0x5f1   : > { %v1278_v53 = vpop.f32.mrb[5].mxu1  ;;  %v670_v19 = vadd.f32 %v1209_v18, %v666_v52 }
 0x5f4   : > { %v1288_v54 = vpop.f32.mrb[6].mxu1 }
 0x5f5   : > { %v834_v55 = vsel %vm393_vm3, %v1288_v54, -1e+30  ;;  %v824_v56 = vpop.f32.mrb[7].mxu1 }
 0x5f6   : > { %v833_v57 = vsel %vm393_vm3, %v824_v56, -1e+30  ;;  %v838_v58 = vsel %vm406_vm2, %v834_v55, -inf }
 0x5f7   : > { %839 = vmax.xlane.f32.xlu0 %v838_v58  ;;  %v835_v59 = vsel %vm406_vm2, %v833_v57, -inf }
 0x5f8   : > { %836 = vmax.xlane.f32.xlu1 %v835_v59 }
 0x684   : > { %v840_v60 = vpop.xlane.xlu0 %839 }
 0x685   : > { %v842_v61 = vsub.f32 %v834_v55, %v840_v60  ;;  %v837_v62 = vpop.xlane.xlu1 %836 }
 0x686   : > { %v841_v63 = vsub.f32 %v833_v57, %v837_v62 }
 0x687   : > { %v845_v0 = vmul.f32 1.442695, %v842_v61 }
 0x688   : > { %v843_v2 = vmul.f32 1.442695, %v841_v63 }
 0x689   : > { %1403 = vpow2.f32 %v845_v0 }
 0x68a   : > { %1405 = vpow2.f32 %v843_v2 }
 0x693   : > { %v1404_v3 = vpop.eup %1403 }
 0x694   : > { %v1406_v4 = vpop.eup %1405  ;;  %v850_v5 = vsel %vm406_vm2, %v1404_v3, 0.0 }
 0x695   : > { %851 = vadd.xlane.f32.xlu1 %v850_v5  ;;  %v847_v6 = vsel %vm406_vm2, %v1406_v4, 0.0 }
 0x696   : > { %848 = vadd.xlane.f32.xlu0 %v847_v6 }
 0x6ac   : > { %857 = vrot.lane.b32.xlu0 %v1815_v16, %s1583_s8  ;;  %v1016_v16 = vld [vmem:[#allocation7 + $0x18] sm:$0xff] }
 0x722   : > { %v852_v8 = vpop.xlane.xlu1 %851 }
 0x723   : > { %1407 = vrcp.f32 %v852_v8  ;;  %v849_v9 = vpop.xlane.xlu0 %848 }
 0x724   : > { %1409 = vrcp.f32 %v849_v9 }
 0x727   : > { %v858_v10 = vpop.permute.xlu0 %857 }
 0x728   : > { %1289 = vmatprep.subr.mxu1 %v858_v10 }
 0x729   : > { %1290 = vmatpush3.msra.mxu1 %v858_v10 }
 0x72d   : > { %v1408_v11 = vpop.eup %1407 }
 0x72e   : > { %v1410_v12 = vpop.eup %1409  ;;  %v856_v14 = vmul.f32 %v1408_v11, %v1404_v3 }
 0x72f   : > { %v855_v13 = vmul.f32 %v1410_v12, %v1406_v4 }
 0x731   : > { %1291 = vmatprep.mubr.msk.f32.mxu1 %vm406_vm2, %v855_v13 }
 0x732   : > { %1292 = vmatmul.mubr.msk.f32.vlgmr.msra.gmra.mrb[8].mxu1 %vm406_vm2, %v856_v14 }
 0x805   : > { %v1293_v15 = vpop.f32.mrb[8].mxu1 }
 0x806   : > { %v932_v17 = vpop.f32.mrb[9].mxu1 }
 0x807   : > { %1297 = vmatmul.mubr.msk.f32.vlgmr.msra.gmra.mrb[2].mxu0 %vm406_vm2, %v932_v17 }
 0x808   : > { %1300 = vmatpush3.msra.mxu0 %v1016_v16  ;;  %1301 = vmatprep.mubr.msk.f32.mxu0 %vm1575_vm0, %v1576_v1 }
 0x80f   : > { %1302 = vmatmul.mubr.msk.f32.vlgmr.msra.gmra.mrb[2].mxu0 %vm406_vm2, %v1293_v15 }
 0x8e2   : > { %v1086_v20 = vpop.f32.mrb[2].mxu0 }
 0x8e3   : > { %v1311_v21 = vadd.f32 %v1086_v20, %v670_v19  ;;  %v1303_v22 = vpop.f32.mrb[3].mxu0 }
 0x8e5   : > { %1091 = vst.msk [vmem:[%s295_s29] sm:$0xff] %vm308_vm1, %v1311_v21 }
 0x8e6   : > { %1510 = shalt.err (!%p1507_p2)
}
 0x8e7   : > { %s1511_s18 = scalar_lea.hbm %s1884_s17, 128  ;;  %s1515_s13 = scalar_lea.hbm %s1935_s6, 256 }
 0x8e8   : > { %p1512_p13 = scmp.ne.s32.totalorder %s1884_s17, %s1511_s18  ;;  %p1516_p4 = scmp.lt.u32.totalorder %s1884_s17, %s1935_s6 }
 0x8e9   : > { %p1517_p5 = scmp.lt.u32.totalorder %s1515_s13, %s1511_s18  ;;  %p1519_p11 = scmp.lt.u32.totalorder %s1511_s18, %s1884_s17 }
 0x8ea   : > { %p1513_p6 = pnand %p1512_p13, %p1949_p0 }
 0x8eb   : > { %p1518_p8 = por %p1517_p5, %p1516_p4 }
 0x8ec   : > { %p1514_p10 = pneg %p1513_p6 }
 0x8ed   : > { %p1520_p1 = por %p1519_p11, %p1518_p8 }
 0x8ef   : > { %p1521_p3 = pnand %p1520_p1, %p1514_p10 }
 0x8f1   : > { %1524 = shalt.err (!%p1521_p3)
}
 0x8f2   : > { %1326 = dma.vmem_to_hbm [thread:$0]  (%p1949_p0), %s1886_s14, 128, %s1884_s17, %s1093_s25  }
 0x8f3 PF: > { %s1118_s29 = sand.u32 1, %s1555_s21   ;;  %p1950_p7 = scmp.ne.s32.totalorder %s1940_s28, 0 }
 0x8f4   : > { %p1951_p9 = scmp.ge.s32.totalorder %s1567_s24, 2  ;;  %s1119_s16 = scalar_lea.sflag [#allocation4], %s1118_s29 }
 0x8f6   : > { %p1340_p12 = pnand %p1951_p9, %p1950_p7 }
 0x8f8   : > { %1550 = dma.done.wait (!%p1340_p12), %s1119_s16, 128  }
 0x8f9   : > { %1552 = vsyncadd (!%p1340_p12), %s1119_s16, 4294967168  ;;  %p20_p2 = scmp.ge.s32.totalorder %s1730_s26, 4   ;;  %s1952_s21 = smov %s1559_s22 }
 0x8fa   : > { %s1953_s22 = smov %s1563_s23  ;;  %s1954_s23 = smov %s1746_s11 }
 0x8fb   : > { %s1955_s24 = smov %s1730_s26  ;;  %22 = sbr.rel (!%p20_p2) target bundleno = 6 (0x6), region = 97 }
 0x902   :  { %1124 = vsyncpa [#allocation3], 1 }
 0x903   :  { %1126 = vsyncpa [#allocation3 + $0x1], 1 }
 0x904   :  { %1127 = vsyncpa [#allocation6], 1 }
 0x905   :  { %1128 = vsyncpa [#allocation4], 1 }
 0x906   :  { %1130 = vsyncpa [#allocation4 + $0x1], 1 }

</bundles_post_ra>
